<compile_context>
chip_gen: v5e
topology: v5e:2x2
jax: 0.10.0
libtpu: 0.0.40
codegen_flags: <defaults>
</compile_context>

<pallas_src>
import jax
import jax.numpy as jnp
from jax.experimental import pallas as pl
from jax.experimental.pallas import tpu as pltpu


_GELU_C = 0.7978845608028654  # sqrt(2/pi)


def _gelu_kernel(x_ref, o_ref):
    x = x_ref[...]
    inner = _GELU_C * (x + 0.044715 * (x * x * x))
    o_ref[...] = 0.5 * x * (1.0 + jnp.tanh(inner))


def gelu_pallas(x: jax.Array, *, target_block_bytes: int = 2 * 1024 * 1024) -> jax.Array:
    orig_shape = x.shape
    orig_dtype = x.dtype
    n = x.size
    if n == 0:
        return x

    itemsize = jnp.dtype(orig_dtype).itemsize
    # Sublane packing for this dtype: 8 rows per vreg at 32-bit, 16 at 16-bit, 32 at 8-bit.
    sublane = 8 * max(1, 4 // itemsize)

    # --- choose a wide lane-dense layout, avoiding any padding when possible ---
    width = None
    for w in (8192, 4096, 2048, 1024, 512, 256, 128):
        if n % w == 0:
            width = w
            break

    flat = x.reshape(-1)
    if width is None:
        # Rare fallback: minimal pad to a 128-lane multiple (never a full tile).
        width = 128
        n_pad = pl.cdiv(n, width) * width
        flat = jnp.pad(flat, (0, n_pad - n))
    else:
        n_pad = n

    rows = n_pad // width
    x2d = flat.reshape(rows, width)

    # --- pick a ~2 MiB block; multiple of the sublane pack, or the full row extent ---
    tile_rows = max(1, target_block_bytes // (width * itemsize))
    if tile_rows >= rows:
        tile_rows = rows  # single block == full array dims (always legal)
    else:
        tile_rows = max(sublane, (tile_rows // sublane) * sublane)

    grid = (pl.cdiv(rows, tile_rows),)

    cost = pl.CostEstimate(
        flops=8 * n,
        transcendentals=n,
        bytes_accessed=2 * n * itemsize,
    )

    out2d = pl.pallas_call(
        _gelu_kernel,
        out_shape=jax.ShapeDtypeStruct((rows, width), orig_dtype),
        grid_spec=pltpu.PrefetchScalarGridSpec(
            num_scalar_prefetch=0,
            grid=grid,
            in_specs=[pl.BlockSpec((tile_rows, width), lambda i: (i, 0))],
            out_specs=pl.BlockSpec((tile_rows, width), lambda i: (i, 0)),
        ),
        compiler_params=pltpu.CompilerParams(
            dimension_semantics=("parallel",),
        ),
        cost_estimate=cost,
    )(x2d)

    if n_pad != n:
        return out2d.reshape(-1)[:n].reshape(orig_shape)
    return out2d.reshape(orig_shape)


def gelu_ref(x: jax.Array) -> jax.Array:
    # Exact formula from the PyTorch module (tanh approximation).
    xf = x.astype(jnp.float32)
    return 0.5 * xf * (1.0 + jnp.tanh(_GELU_C * (xf + 0.044715 * xf ** 3)))


if __name__ == "__main__":
    key = jax.random.PRNGKey(0)

    # NCHW-shaped example input (module is elementwise; any shape works).
    x = jax.random.normal(key, (2, 4, 16, 16), dtype=jnp.float32)
    out = gelu_pallas(x)
    jax.block_until_ready(out)
    ref = gelu_ref(x)
    assert out.shape == x.shape and out.dtype == x.dtype
    assert jnp.allclose(out, ref, atol=1e-5, rtol=1e-5)

    # Extra coverage: non-divisible size (pad path), partial trailing row block,
    # and a bf16 input (16-sublane packing path).
    for shape, dtype, atol in [((3, 5, 7), jnp.float32, 1e-5),
                               ((16, 1000), jnp.float32, 1e-5),
                               ((2, 8, 128), jnp.bfloat16, 2e-2)]:
        key, sub = jax.random.split(key)
        xt = jax.random.normal(sub, shape, dtype=dtype)
        ot = gelu_pallas(xt)
        jax.block_until_ready(ot)
        assert ot.shape == xt.shape and ot.dtype == xt.dtype
        assert jnp.allclose(ot.astype(jnp.float32), gelu_ref(xt), atol=atol, rtol=atol)

    print("KERNEL_OK")
</pallas_src>

<mosaic_0001>
module attributes {stable_mosaic.version = 11 : i64} {
  func.func @_gelu_kernel(%arg0: i32, %arg1: memref<1x2048xf32, #tpu.memory_space<vmem>>, %arg2: memref<1x2048xf32, #tpu.memory_space<vmem>>) attributes {dimension_semantics = [#tpu.dimension_semantics<parallel>], iteration_bounds = array<i64: 1>, scalar_prefetch = 0 : i64, scratch_operands = 0 : i64, tpu.core_type = #tpu.core_type<tc>, window_params = [{transform_indices = @transform_0, window_bounds = array<i64: 1, 2048>}, {transform_indices = @transform_1, window_bounds = array<i64: 1, 2048>}]} {
    %c0 = arith.constant 0 : index
    %c0_0 = arith.constant 0 : index
    %0 = vector.load %arg1[%c0, %c0_0] : memref<1x2048xf32, #tpu.memory_space<vmem>>, vector<1x2048xf32>
    %1 = arith.mulf %0, %0 : vector<1x2048xf32>
    %2 = arith.mulf %1, %0 : vector<1x2048xf32>
    %cst = arith.constant 4.471500e-02 : f32
    %3 = vector.broadcast %cst : f32 to vector<1x2048xf32>
    %4 = arith.mulf %3, %2 : vector<1x2048xf32>
    %5 = arith.addf %0, %4 : vector<1x2048xf32>
    %cst_1 = arith.constant 0.797884583 : f32
    %6 = vector.broadcast %cst_1 : f32 to vector<1x2048xf32>
    %7 = arith.mulf %6, %5 : vector<1x2048xf32>
    %cst_2 = arith.constant 5.000000e-01 : f32
    %8 = vector.broadcast %cst_2 : f32 to vector<1x2048xf32>
    %9 = arith.mulf %8, %0 : vector<1x2048xf32>
    %10 = math.tanh %7 : vector<1x2048xf32>
    %cst_3 = arith.constant 1.000000e+00 : f32
    %11 = vector.broadcast %cst_3 : f32 to vector<1x2048xf32>
    %12 = arith.addf %11, %10 : vector<1x2048xf32>
    %13 = arith.mulf %9, %12 : vector<1x2048xf32>
    %c0_4 = arith.constant 0 : index
    %c0_5 = arith.constant 0 : index
    %14 = vector.load %arg2[%c0_4, %c0_5] : memref<1x2048xf32, #tpu.memory_space<vmem>>, vector<1x2048xf32>
    tpu.vector_store %arg2[%c0_4, %c0_5], %13 {strides = array<i32>} : memref<1x2048xf32, #tpu.memory_space<vmem>>, vector<1x2048xf32>,
    return
  }
  func.func @transform_0(%arg0: i32) -> (i32, i32) {
    %c0_i32 = arith.constant 0 : i32
    %c0_i32_0 = arith.constant 0 : i32
    return %arg0, %c0_i32 : i32, i32
  }
  func.func @transform_1(%arg0: i32) -> (i32, i32) {
    %c0_i32 = arith.constant 0 : i32
    %c0_i32_0 = arith.constant 0 : i32
    return %arg0, %c0_i32 : i32, i32
  }
}

</mosaic_0001>

<bundles_post_ra>
// kernel: tpu_custom_call.1
= control target key start
LH: loop header
LB: loop body
LE: loop exit
PB: predicated region body
PF: predicated region fallthrough
CT: control target
= control target key end

     0   :  { %6 = vsyncpa [#allocation3], 0  ;;  %s138_s0 = inlined_call_operand.hbm [shape: f32[1,2048], index: 0, kind: input, shape index: {}]   ;;  %s139_s1 = inlined_call_operand.hbm [shape: f32[1,2048], index: 1, kind: output, shape index: {}]  }
   0x1   :  { %7 = vsyncpa [#allocation4], 0  ;;  %s13_s8 = sshll.u32 %s138_s0, 4  ;;  %s120_s9 = smov [#allocation2]   ;;  %s14_s8 = int_to_ptr.hbm [resolvable:$true] %s13_s8 }
   0x2   :  { %s15_s10 = sshll.u32 %s120_s9, 4  ;;  %s16_s10 = int_to_ptr.vmem [resolvable:$true] %s15_s10 }
   0x3   :  { %18 = dma.hbm_to_vmem [thread:$0]  %s14_s8, 256, %s16_s10, [#allocation3]  }
   0x4   :  { %116 = dma.done.wait [#allocation3], 256  }
   0x5   :  { %117 = vsyncadd [#allocation3], 4294967040  ;;  %v23_v0 = vld [vmem:[#allocation2] sm:$0xff]  ;;  %v24_v1 = vld [vmem:[#allocation2 + $0x8] sm:$0xff]  ;;  %s121_s0 = smov [#allocation5]   ;;  %s52_s14 = sshll.u32 %s139_s1, 4  ;;  %s53_s14 = int_to_ptr.hbm [resolvable:$true] %s52_s14 }
   0x6   :  { %v25_v2 = vmul.f32 %v23_v0, %v23_v0  ;;  %v26_v3 = vmul.f32 %v24_v1, %v24_v1  ;;  %v35_v12 = vmul.f32 0.5, %v23_v0  ;;  %v36_v14 = vmul.f32 0.5, %v24_v1  ;;  %s50_s11 = sshll.u32 %s121_s0, 4  ;;  %s51_s11 = int_to_ptr.vmem [resolvable:$true] %s50_s11 }
   0x8   :  { %v27_v4 = vmul.f32 %v25_v2, %v23_v0  ;;  %v28_v5 = vmul.f32 %v26_v3, %v24_v1 }
   0xa   :  { %v29_v6 = vmul.f32 0.044715, %v27_v4  ;;  %v30_v7 = vmul.f32 0.044715, %v28_v5 }
   0xc   :  { %v31_v8 = vadd.f32 %v29_v6, %v23_v0  ;;  %v32_v9 = vadd.f32 %v30_v7, %v24_v1 }
   0xe   :  { %v33_v10 = vmul.f32 0.7978846, %v31_v8  ;;  %v34_v11 = vmul.f32 0.7978846, %v32_v9 }
  0x10   :  { %64 = vtanh.f32 %v33_v10 }
  0x11   :  { %66 = vtanh.f32 %v34_v11 }
  0x16   :  { %v65_v13 = vpop.eup %64 }
  0x17   :  { %v67_v15 = vpop.eup %66  ;;  %v39_v16 = vadd.f32 1.0, %v65_v13 }
  0x18   :  { %v40_v17 = vadd.f32 1.0, %v67_v15 }
  0x19   :  { %v41_v18 = vmul.f32 %v39_v16, %v35_v12 }
  0x1a   :  { %v42_v19 = vmul.f32 %v40_v17, %v36_v14 }
  0x1b   :  { %43 = vst [vmem:[#allocation5] sm:$0xff] %v41_v18 }
  0x1c   :  { %44 = vst [vmem:[#allocation5 + $0x8] sm:$0xff] %v42_v19 }
  0x1d   :  { %55 = dma.vmem_to_hbm [thread:$0]  %s51_s11, 256, %s53_s14, [#allocation4]  }
  0x1e   :  { %118 = dma.done.wait [#allocation4], 256  }
  0x1f   :  { %119 = vsyncadd [#allocation4], 4294967040 }
  0x20   :  { %60 = vsyncpa [#allocation3], 1 }
  0x21   :  { %61 = vsyncpa [#allocation4], 1 }

</bundles_post_ra>
